<compile_context>
chip_gen: v5e
topology: v5e:2x2
jax: 0.10.0
libtpu: 0.0.40
codegen_flags: <defaults>
</compile_context>

<pallas_src>
import functools
import math

import jax
import jax.numpy as jnp
from jax.experimental import pallas as pl
from jax.experimental.pallas import tpu as pltpu


def _round_up(x: int, m: int) -> int:
    return ((x + m - 1) // m) * m


def _pick_tile(dim: int, prefs, align: int) -> int:
    """Pick a tile from `prefs` (descending). Small dims round up to `align`;
    tiles that divide `dim` exactly are preferred (zero wrapper padding)."""
    if dim <= prefs[-1]:
        return _round_up(dim, align)
    for t in prefs:                       # exact divisor -> no pad / no slice
        if dim % t == 0:
            return t
    return min(prefs, key=lambda t: (_round_up(dim, t), -t))


def _cdist_l2_kernel(x2_ref, y2_ref, s1_ref, s2_ref, out_ref, acc_ref, *,
                     fp32_x3):
    """One (TL1, TL2) tile of Euclidean cdist via d^2 = |x|^2 + |y|^2 - 2 x.y^T,
    accumulating the Gram term over D chunks (innermost grid axis).

    x2_ref: (1, TL1, 1)   y2_ref: (1, 1, TL2)   (precomputed in the wrapper)
    s1_ref: (1, TL1, DK)  s2_ref: (1, TL2, DK)
    out_ref: (1, TL1, TL2)    acc_ref: (TL1, TL2) f32 scratch
    """
    k = pl.program_id(3)

    @pl.when(k == 0)
    def _():
        acc_ref[...] = jnp.zeros_like(acc_ref)

    x = s1_ref[0]                               # [TL1, DK]
    y = s2_ref[0]                               # [TL2, DK]
    dims = (((1,), (1,)), ((), ()))

    if fp32_x3:
        # 3-pass bf16 (hi/lo) decomposition of the f32 Gram matmul: half the
        # MXU passes of Precision.HIGHEST; the dropped lo*lo term is far below
        # the cancellation error of this formulation.
        x_hi = x.astype(jnp.bfloat16)
        x_lo = (x - x_hi.astype(jnp.float32)).astype(jnp.bfloat16)
        y_hi = y.astype(jnp.bfloat16)
        y_lo = (y - y_hi.astype(jnp.float32)).astype(jnp.bfloat16)
        xy = (jax.lax.dot_general(x_hi, y_hi, dims,
                                  preferred_element_type=jnp.float32)
              + jax.lax.dot_general(x_hi, y_lo, dims,
                                    preferred_element_type=jnp.float32)
              + jax.lax.dot_general(x_lo, y_hi, dims,
                                    preferred_element_type=jnp.float32))
    else:
        # bf16 inputs: single native MXU pass with f32 accumulation.
        xy = jax.lax.dot_general(x, y, dims,
                                 preferred_element_type=jnp.float32)
    acc_ref[...] += xy

    @pl.when(k == pl.num_programs(3) - 1)
    def _():
        x2 = x2_ref[0]                          # [TL1, 1]
        y2 = y2_ref[0]                          # [1, TL2]
        # Clamp: cancellation can drive d^2 slightly negative for near-dupes.
        d2 = jnp.maximum(x2 + y2 - 2.0 * acc_ref[...], 0.0)
        out_ref[0] = jnp.sqrt(d2).astype(out_ref.dtype)


def _cdist_pnorm_kernel(s1_ref, s2_ref, out_ref, *, p, d_chunk, n_chunks):
    """General p-norm tile (VPU path). Loops over lane-aligned D chunks with a
    (TL1, TL2) f32 accumulator; the broadcast temp is kept ~512 KiB."""
    tl1, tl2 = out_ref.shape[1], out_ref.shape[2]
    is_inf = math.isinf(p)
    int_p = (not is_inf) and float(p).is_integer() and 1 <= int(p) <= 4

    def chunk(c, acc):
        off = pl.multiple_of(c * d_chunk, d_chunk)
        xc = s1_ref[0, :, pl.ds(off, d_chunk)].astype(jnp.float32)   # [TL1,dc]
        yc = s2_ref[0, :, pl.ds(off, d_chunk)].astype(jnp.float32)   # [TL2,dc]
        diff = jnp.abs(xc[:, None, :] - yc[None, :, :])              # [TL1,TL2,dc]
        if is_inf:
            return jnp.maximum(acc, jnp.max(diff, axis=-1))
        if int_p:
            ip = int(p)
            pw = diff
            for _ in range(ip - 1):            # VALU multiplies; EUP stays idle
                pw = pw * diff
            return acc + jnp.sum(pw, axis=-1)
        # TODO(synk): non-integer / large p goes through exp/log on the EUP;
        # tiny deviations vs torch.cdist are expected (exp(-inf)=0 keeps
        # zero differences exact).
        return acc + jnp.sum(jnp.exp(jnp.log(diff) * float(p)), axis=-1)

    acc0 = jnp.zeros((tl1, tl2), jnp.float32)
    if n_chunks == 1:
        acc = chunk(0, acc0)
    else:
        acc = jax.lax.fori_loop(0, n_chunks, chunk, acc0)

    if (not is_inf) and p != 1:
        # acc == 0 -> log = -inf -> exp = 0, so zero distances stay exact.
        acc = jnp.exp(jnp.log(acc) * (1.0 / float(p)))
    out_ref[0] = acc.astype(out_ref.dtype)


def wrapper_cdist(set1: jax.Array, set2: jax.Array, p=2) -> jax.Array:
    """Pallas TPU implementation of WrapperCDist.forward (torch.cdist).

    Args:
        set1: [B, L1, D]
        set2: [B, L2, D]
        p:    order of the p-norm (default 2, matching the module default).

    Returns:
        [B, L1, L2] pairwise distances (promoted floating dtype).
    """
    B, L1, D = set1.shape
    B2, L2, D2 = set2.shape
    assert B == B2 and D == D2, "batch / feature dims must match"
    if not (p == float("inf") or p > 0):
        # TODO(synk): p == 0 counting variant of torch.cdist not implemented.
        raise NotImplementedError("p must be > 0 (or inf)")

    out_dtype = jnp.promote_types(set1.dtype, set2.dtype)
    if not jnp.issubdtype(out_dtype, jnp.floating):
        out_dtype = jnp.dtype(jnp.float32)
    if out_dtype == jnp.dtype(jnp.float64):
        # TODO(synk): f64 has no MXU path on TPU; computed and stored in f32.
        out_dtype = jnp.dtype(jnp.float32)
    compute_dtype = (jnp.bfloat16 if out_dtype == jnp.dtype(jnp.bfloat16)
                     else jnp.float32)

    s1 = set1.astype(compute_dtype) if set1.dtype != compute_dtype else set1
    s2 = set2.astype(compute_dtype) if set2.dtype != compute_dtype else set2

    use_l2 = (p == 2)
    itemsize = jnp.dtype(compute_dtype).itemsize

    if use_l2:
        # Taller tl1 for bf16 (s2 is re-streamed per i-tile, so arithmetic
        # intensity ~ tl1 / itemsize); f32 keeps 256 to bound VMEM.
        tl1 = _pick_tile(L1,
                         (512, 256, 128) if compute_dtype == jnp.bfloat16
                         else (256, 128), align=8)
        tl2 = _pick_tile(L2, (256, 128), align=128)
        # Grid-tile D so per-step VMEM stays a few MiB on every generation.
        if D > 512:
            d_pad = _round_up(D, 128)
            dk = next(c for c in (512, 256, 128) if d_pad % c == 0)
        else:
            d_pad, dk = D, D
        n_k = max(d_pad // dk, 1)
    else:
        # VPU fallback: keep the [tl1, tl2, d_chunk] f32 broadcast temp
        # ~512 KiB (about 2x the vreg file) so chunk iterations don't thrash
        # VMEM; d_chunk stays lane-aligned (128) to avoid sub-vreg lane slices.
        tl1, tl2 = 8, 128
        d_chunk = D if D <= 128 else 128
        d_pad = _round_up(D, d_chunk)
        n_chunks = d_pad // d_chunk

    l1p = _round_up(L1, tl1)
    l2p = _round_up(L2, tl2)
    if l1p != L1 or d_pad != D:
        s1 = jnp.pad(s1, ((0, 0), (0, l1p - L1), (0, d_pad - D)))
    if l2p != L2 or d_pad != D:
        s2 = jnp.pad(s2, ((0, 0), (0, l2p - L2), (0, d_pad - D)))

    in_bytes = (s1.size + s2.size) * itemsize
    out_bytes = B * l1p * l2p * jnp.dtype(out_dtype).itemsize

    if use_l2:
        # Precompute squared norms once in f32 (padded rows are zero -> norms
        # are zero); they arrive lane/sublane-dense, no in-kernel relayout.
        s1f = s1.astype(jnp.float32)
        s2f = s2.astype(jnp.float32)
        x2 = jnp.sum(s1f * s1f, axis=-1, keepdims=True)        # [B, l1p, 1]
        y2 = jnp.sum(s2f * s2f, axis=-1)[:, None, :]           # [B, 1, l2p]

        fp32_x3 = (compute_dtype == jnp.float32)
        kernel = functools.partial(_cdist_l2_kernel, fp32_x3=fp32_x3)
        grid = (B, l1p // tl1, l2p // tl2, n_k)
        flops = 2 * B * l1p * l2p * d_pad * (3 if fp32_x3 else 1)

        out = pl.pallas_call(
            kernel,
            out_shape=jax.ShapeDtypeStruct((B, l1p, l2p), out_dtype),
            grid=grid,
            in_specs=[
                pl.BlockSpec((1, tl1, 1), lambda b, i, j, k: (b, i, 0)),
                pl.BlockSpec((1, 1, tl2), lambda b, i, j, k: (b, 0, j)),
                pl.BlockSpec((1, tl1, dk), lambda b, i, j, k: (b, i, k)),
                pl.BlockSpec((1, tl2, dk), lambda b, i, j, k: (b, j, k)),
            ],
            out_specs=pl.BlockSpec((1, tl1, tl2), lambda b, i, j, k: (b, i, j)),
            scratch_shapes=[pltpu.VMEM((tl1, tl2), jnp.float32)],
            compiler_params=pltpu.CompilerParams(
                dimension_semantics=("parallel", "parallel", "parallel",
                                     "arbitrary"),
                vmem_limit_bytes=32 * 1024 * 1024),
            cost_estimate=pl.CostEstimate(
                flops=flops, transcendentals=0,
                bytes_accessed=in_bytes + out_bytes + 4 * (x2.size + y2.size)),
        )(x2, y2, s1, s2)
    else:
        kernel = functools.partial(_cdist_pnorm_kernel, p=p,
                                   d_chunk=d_chunk, n_chunks=n_chunks)
        grid = (B, l1p // tl1, l2p // tl2)
        needs_eup = not (math.isinf(p)
                         or (float(p).is_integer() and 1 <= int(p) <= 4))
        transc = (2 * B * l1p * l2p * d_pad) if needs_eup else 0

        out = pl.pallas_call(
            kernel,
            out_shape=jax.ShapeDtypeStruct((B, l1p, l2p), out_dtype),
            grid=grid,
            in_specs=[
                pl.BlockSpec((1, tl1, d_pad), lambda b, i, j: (b, i, 0)),
                pl.BlockSpec((1, tl2, d_pad), lambda b, i, j: (b, j, 0)),
            ],
            out_specs=pl.BlockSpec((1, tl1, tl2), lambda b, i, j: (b, i, j)),
            compiler_params=pltpu.CompilerParams(
                dimension_semantics=("parallel", "parallel", "parallel"),
                vmem_limit_bytes=32 * 1024 * 1024),
            cost_estimate=pl.CostEstimate(
                flops=3 * B * l1p * l2p * d_pad, transcendentals=transc,
                bytes_accessed=in_bytes + out_bytes),
        )(s1, s2)

    if l1p != L1 or l2p != L2:
        out = out[:, :L1, :L2]
    return out


if __name__ == "__main__":
    # Small deterministic shapes consistent with the module's forward signature.
    B, L1, L2, D = 2, 8, 16, 32
    key = jax.random.PRNGKey(0)
    k1, k2 = jax.random.split(key)
    set1 = jax.random.normal(k1, (B, L1, D), dtype=jnp.float32)
    set2 = jax.random.normal(k2, (B, L2, D), dtype=jnp.float32)

    diff = set1[:, :, None, :] - set2[:, None, :, :]
    absd = jnp.abs(diff)

    # p = 2 (module default): MXU path (bf16x3 Gram + precomputed norms).
    out2 = jax.block_until_ready(wrapper_cdist(set1, set2, p=2))
    ref2 = jnp.sqrt(jnp.sum(diff * diff, axis=-1))
    assert out2.shape == (B, L1, L2)
    assert jnp.allclose(out2, ref2, atol=1e-3, rtol=1e-3), float(
        jnp.max(jnp.abs(out2 - ref2)))

    # p = 1: VPU fallback path.
    out1 = jax.block_until_ready(wrapper_cdist(set1, set2, p=1))
    ref1 = jnp.sum(absd, axis=-1)
    assert jnp.allclose(out1, ref1, atol=1e-4, rtol=1e-4)

    # p = 3: integer-p specialization (repeated multiplies + exp/log root).
    out3 = jax.block_until_ready(wrapper_cdist(set1, set2, p=3))
    ref3 = jnp.sum(absd ** 3, axis=-1) ** (1.0 / 3.0)
    assert jnp.allclose(out3, ref3, atol=1e-3, rtol=1e-3)

    # p = inf: max-reduction path.
    outi = jax.block_until_ready(wrapper_cdist(set1, set2, p=float("inf")))
    refi = jnp.max(absd, axis=-1)
    assert jnp.allclose(outi, refi, atol=1e-4, rtol=1e-4)

    print("KERNEL_OK")
</pallas_src>

<mosaic_0001>
module attributes {stable_mosaic.version = 11 : i64} {
  func.func @_cdist_l2_kernel(%arg0: i32, %arg1: i32, %arg2: i32, %arg3: i32, %arg4: memref<1x8x1xf32, #tpu.memory_space<vmem>>, %arg5: memref<1x1x128xf32, #tpu.memory_space<vmem>>, %arg6: memref<1x8x32xf32, #tpu.memory_space<vmem>>, %arg7: memref<1x128x32xf32, #tpu.memory_space<vmem>>, %arg8: memref<1x8x128xf32, #tpu.memory_space<vmem>>, %arg9: memref<8x128xf32, #tpu.memory_space<vmem>>) attributes {dimension_semantics = [#tpu.dimension_semantics<parallel>, #tpu.dimension_semantics<parallel>, #tpu.dimension_semantics<parallel>, #tpu.dimension_semantics<arbitrary>], iteration_bounds = array<i64: 2, 1, 1, 1>, scalar_prefetch = 0 : i64, scratch_operands = 1 : i64, tpu.core_type = #tpu.core_type<tc>, window_params = [{transform_indices = @transform_0, window_bounds = array<i64: 1, 8, 1>}, {transform_indices = @transform_1, window_bounds = array<i64: 1, 1, 128>}, {transform_indices = @transform_2, window_bounds = array<i64: 1, 8, 32>}, {transform_indices = @transform_3, window_bounds = array<i64: 1, 128, 32>}, {transform_indices = @transform_4, window_bounds = array<i64: 1, 8, 128>}]} {
    %c0_i32 = arith.constant 0 : i32
    %0 = arith.cmpi eq, %arg3, %c0_i32 : i32
    %1 = arith.extui %0 : i1 to i32
    %c0_i32_0 = arith.constant 0 : i32
    %2 = arith.cmpi ne, %1, %c0_i32_0 : i32
    scf.if %2 {
      %cst_14 = arith.constant 0.000000e+00 : f32
      %26 = vector.broadcast %cst_14 : f32 to vector<8x128xf32>
      %c0_15 = arith.constant 0 : index
      %c0_16 = arith.constant 0 : index
      %27 = vector.load %arg9[%c0_15, %c0_16] : memref<8x128xf32, #tpu.memory_space<vmem>>, vector<8x128xf32>
      tpu.vector_store %arg9[%c0_15, %c0_16], %26 {strides = array<i32>} : memref<8x128xf32, #tpu.memory_space<vmem>>, vector<8x128xf32>,
    } else {
    }
    %c0 = arith.constant 0 : index
    %c0_1 = arith.constant 0 : index
    %c0_2 = arith.constant 0 : index
    %3 = vector.load %arg6[%c0, %c0_1, %c0_2] : memref<1x8x32xf32, #tpu.memory_space<vmem>>, vector<1x8x32xf32>
    %4 = vector.shape_cast %3 : vector<1x8x32xf32> to vector<8x32xf32>
    %c0_3 = arith.constant 0 : index
    %c0_4 = arith.constant 0 : index
    %c0_5 = arith.constant 0 : index
    %5 = vector.load %arg7[%c0_3, %c0_4, %c0_5] : memref<1x128x32xf32, #tpu.memory_space<vmem>>, vector<1x128x32xf32>
    %6 = vector.shape_cast %5 : vector<1x128x32xf32> to vector<128x32xf32>
    %7 = arith.truncf %4 : vector<8x32xf32> to vector<8x32xbf16>
    %8 = arith.extf %7 : vector<8x32xbf16> to vector<8x32xf32>
    %9 = arith.subf %4, %8 : vector<8x32xf32>
    %10 = arith.truncf %9 : vector<8x32xf32> to vector<8x32xbf16>
    %11 = arith.truncf %6 : vector<128x32xf32> to vector<128x32xbf16>
    %12 = arith.extf %11 : vector<128x32xbf16> to vector<128x32xf32>
    %13 = arith.subf %6, %12 : vector<128x32xf32>
    %14 = arith.truncf %13 : vector<128x32xf32> to vector<128x32xbf16>
    %cst = arith.constant dense<0.000000e+00> : vector<8x128xf32>
    %15 = tpu.matmul %7, %11, %cst {dimension_numbers = #tpu.dot_dimension_numbers<[1], [1], [0], [0], [0, 0, 1, 0], [], []>} : vector<8x32xbf16>, vector<128x32xbf16>, vector<8x128xf32> -> vector<8x128xf32>
    %cst_6 = arith.constant dense<0.000000e+00> : vector<8x128xf32>
    %16 = tpu.matmul %7, %14, %cst_6 {dimension_numbers = #tpu.dot_dimension_numbers<[1], [1], [0], [0], [0, 0, 1, 0], [], []>} : vector<8x32xbf16>, vector<128x32xbf16>, vector<8x128xf32> -> vector<8x128xf32>
    %17 = arith.addf %15, %16 : vector<8x128xf32>
    %cst_7 = arith.constant dense<0.000000e+00> : vector<8x128xf32>
    %18 = tpu.matmul %10, %11, %cst_7 {dimension_numbers = #tpu.dot_dimension_numbers<[1], [1], [0], [0], [0, 0, 1, 0], [], []>} : vector<8x32xbf16>, vector<128x32xbf16>, vector<8x128xf32> -> vector<8x128xf32>
    %19 = arith.addf %17, %18 : vector<8x128xf32>
    %c0_8 = arith.constant 0 : index
    %c0_9 = arith.constant 0 : index
    %20 = vector.load %arg9[%c0_8, %c0_9] : memref<8x128xf32, #tpu.memory_space<vmem>>, vector<8x128xf32>
    %21 = arith.addf %20, %19 : vector<8x128xf32>
    %c0_10 = arith.constant 0 : index
    %c0_11 = arith.constant 0 : index
    %22 = vector.load %arg9[%c0_10, %c0_11] : memref<8x128xf32, #tpu.memory_space<vmem>>, vector<8x128xf32>
    tpu.vector_store %arg9[%c0_10, %c0_11], %21 {strides = array<i32>} : memref<8x128xf32, #tpu.memory_space<vmem>>, vector<8x128xf32>,
    %c0_i32_12 = arith.constant 0 : i32
    %23 = arith.cmpi eq, %arg3, %c0_i32_12 : i32
    %24 = arith.extui %23 : i1 to i32
    %c0_i32_13 = arith.constant 0 : i32
    %25 = arith.cmpi ne, %24, %c0_i32_13 : i32
    scf.if %25 {
      %c0_14 = arith.constant 0 : index
      %c0_15 = arith.constant 0 : index
      %c0_16 = arith.constant 0 : index
      %26 = vector.load %arg4[%c0_14, %c0_15, %c0_16] : memref<1x8x1xf32, #tpu.memory_space<vmem>>, vector<1x8x1xf32>
      %27 = vector.shape_cast %26 : vector<1x8x1xf32> to vector<8x1xf32>
      %c0_17 = arith.constant 0 : index
      %c0_18 = arith.constant 0 : index
      %c0_19 = arith.constant 0 : index
      %28 = vector.load %arg5[%c0_17, %c0_18, %c0_19] : memref<1x1x128xf32, #tpu.memory_space<vmem>>, vector<1x1x128xf32>
      %29 = vector.shape_cast %28 : vector<1x1x128xf32> to vector<1x128xf32>
      %30 = vector.broadcast %27 : vector<8x1xf32> to vector<8x128xf32>
      %31 = vector.broadcast %29 : vector<1x128xf32> to vector<8x128xf32>
      %32 = arith.addf %30, %31 : vector<8x128xf32>
      %c0_20 = arith.constant 0 : index
      %c0_21 = arith.constant 0 : index
      %33 = vector.load %arg9[%c0_20, %c0_21] : memref<8x128xf32, #tpu.memory_space<vmem>>, vector<8x128xf32>
      %cst_22 = arith.constant 2.000000e+00 : f32
      %34 = vector.broadcast %cst_22 : f32 to vector<8x128xf32>
      %35 = arith.mulf %34, %33 : vector<8x128xf32>
      %36 = arith.subf %32, %35 : vector<8x128xf32>
      %cst_23 = arith.constant 0.000000e+00 : f32
      %37 = vector.broadcast %cst_23 : f32 to vector<8x128xf32>
      %38 = arith.maximumf %36, %37 : vector<8x128xf32>
      %39 = math.sqrt %38 : vector<8x128xf32>
      %c0_24 = arith.constant 0 : index
      %c0_25 = arith.constant 0 : index
      %c0_26 = arith.constant 0 : index
      %40 = vector.load %arg8[%c0_24, %c0_25, %c0_26] : memref<1x8x128xf32, #tpu.memory_space<vmem>>, vector<1x8x128xf32>
      %41 = vector.shape_cast %40 : vector<1x8x128xf32> to vector<8x128xf32>
      %42 = vector.shape_cast %39 : vector<8x128xf32> to vector<1x8x128xf32>
      tpu.vector_store %arg8[%c0_24, %c0_25, %c0_26], %42 {strides = array<i32>} : memref<1x8x128xf32, #tpu.memory_space<vmem>>, vector<1x8x128xf32>,
    } else {
    }
    return
  }
  func.func @transform_0(%arg0: i32, %arg1: i32, %arg2: i32, %arg3: i32) -> (i32, i32, i32) {
    %c0_i32 = arith.constant 0 : i32
    %c0_i32_0 = arith.constant 0 : i32
    return %arg0, %arg1, %c0_i32 : i32, i32, i32
  }
  func.func @transform_1(%arg0: i32, %arg1: i32, %arg2: i32, %arg3: i32) -> (i32, i32, i32) {
    %c0_i32 = arith.constant 0 : i32
    %c0_i32_0 = arith.constant 0 : i32
    return %arg0, %c0_i32, %arg2 : i32, i32, i32
  }
  func.func @transform_2(%arg0: i32, %arg1: i32, %arg2: i32, %arg3: i32) -> (i32, i32, i32) {
    %c0_i32 = arith.constant 0 : i32
    return %arg0, %arg1, %arg3 : i32, i32, i32
  }
  func.func @transform_3(%arg0: i32, %arg1: i32, %arg2: i32, %arg3: i32) -> (i32, i32, i32) {
    %c0_i32 = arith.constant 0 : i32
    return %arg0, %arg2, %arg3 : i32, i32, i32
  }
  func.func @transform_4(%arg0: i32, %arg1: i32, %arg2: i32, %arg3: i32) -> (i32, i32, i32) {
    %c0_i32 = arith.constant 0 : i32
    return %arg0, %arg1, %arg2 : i32, i32, i32
  }
}

</mosaic_0001>

<bundles_post_ra>
// kernel: tpu_custom_call.1
= control target key start
LH: loop header
LB: loop body
LE: loop exit
PB: predicated region body
PF: predicated region fallthrough
CT: control target
= control target key end

     0   :  { %9 = vsyncpa [#allocation4], 0  ;;  %s1079_s0 = inlined_call_operand.vmem [shape: f32[2,8,1], index: 0, kind: input, shape index: {}]   ;;  %s1080_s1 = inlined_call_operand.vmem [shape: f32[2,1,128], index: 1, kind: input, shape index: {}]   ;;  %s1081_s2 = inlined_call_operand.vmem [shape: f32[2,8,32], index: 2, kind: input, shape index: {}]   ;;  %s1082_s3 = inlined_call_operand.vmem [shape: f32[2,128,32], index: 3, kind: input, shape index: {}]   ;;  %s1083_s4 = inlined_call_operand.hbm [shape: f32[2,8,128], index: 4, kind: output, shape index: {}]  }
   0x1   :  { %11 = vsyncpa [#allocation4 + $0x1], 0  ;;  %s927_s15 = smov 0   ;;  %s929_s16 = smov 0  }
   0x2   :  { %s931_s17 = smov 0   ;;  %s933_s18 = smov 0  }
   0x3   :  { %s935_s19 = smov 0   ;;  %s937_s20 = smov 0  }
   0x4 LB: > { %s743_s21 = sadd.s32 4294967295, %s899_s20   ;;  %s744_s22 = sadd.s32 4294967294, %s899_s20   ;;  %s899_s20 = sphi %s937_s20, %s17_s20   ;;  %s895_s19 = sphi %s935_s19, %s1090_s19   ;;  %s891_s18 = sphi %s933_s18, %s1089_s18   ;;  %s887_s17 = sphi %s931_s17, %s1088_s17   ;;  %s883_s16 = sphi %s929_s16, %s1087_s16   ;;  %s879_s15 = sphi %s927_s15, %s1086_s15  }
   0x5   : > { %s43_s23 = sadd.s32 1, %s895_s19  ;;  %s170_s24 = sadd.s32 1, %s887_s17 }
   0x6   : > { %p45_p0 = scmp.ge.s32.totalorder %s43_s23, 2  ;;  %p180_p1 = scmp.ne.s32.totalorder %s887_s17, %s883_s16 }
   0x7   : > { %p181_p2 = scmp.eq.s32.totalorder %s743_s21, 1  ;;  %p186_p3 = scmp.ne.s32.totalorder %s883_s16, %s879_s15 }
   0x8   : > { %s1092_s23 = smov (%p45_p0, %s43_s23), 0  ;;  %p187_p5 = scmp.eq.s32.totalorder %s744_s22, 1 }
   0x9   : > { %p967_p4 = por %p181_p2, %p180_p1  ;;  %s163_s26 = ssub.s32 %s895_s19, %s1092_s23 }
   0xa   : > { %p747_p6 = scmp.ge.s32.totalorder %s899_s20, 1  ;;  %p168_p7 = scmp.eq.s32.totalorder %s163_s26, 0 }
   0xb   : > { %p974_p8 = por %p187_p5, %p186_p3  ;;  %p253_p9 = scmp.lt.s32.totalorder %s899_s20, 3 }
   0xc   : > { %s980_s28 = scalar_select %p168_p7, %s887_s17, %s170_s24  }
   0xd   : > { %p254_p10 = pnand %p747_p6, %p253_p9 }
   0xe   : > { %p309_p11 = scmp.lt.s32.totalorder (!%p254_p10), %s891_s18, 1  ;;  %s306_s26 = sand.u32 (!%p254_p10), 1, %s883_s16  }
   0xf   : > { %257 = sbr.rel (%p254_p10) target bundleno = 259 (0x103), region = 36  ;;  %s841_s21 = scalar_lea.hbm (!%p254_p10), %s1083_s4, 16 }
  0x14   : > { %s984_s29 = scalar_select %p309_p11, %s891_s18, 1  ;;  %vm427_vm0 = vcmask 261120  }
  0x16   : > { %s760_s30 = sshll.u32 %s984_s29, 7  ;;  %s749_s8 = sshll.u32 %s984_s29, 3 }
  0x17   : > { %s990_s7 = scalar_lea.vmem %s1082_s3, %s760_s30  ;;  %s315_s11 = scalar_lea.vmem %s1079_s0, %s749_s8 }
  0x18   : > { %v365_v0 = vld [vmem:[%s990_s7 + $0x70] sm:$0xff]  ;;  %v366_v1 = vld [vmem:[%s990_s7 + $0x78] sm:$0xff]  ;;  %v363_v2 = vld [vmem:[%s990_s7 + $0x60] sm:$0xff]  ;;  %s331_s14 = scalar_lea.vmem %s1081_s2, %s749_s8  ;;  %s321_s24 = scalar_lea.vmem %s1080_s1, %s984_s29 }
  0x19   : > { %v385_v3 = vpack.c.bf16 %v365_v0, %v365_v0  ;;  %v386_v4 = vpack.c.bf16 %v366_v1, %v366_v1  ;;  %v364_v5 = vld [vmem:[%s990_s7 + $0x68] sm:$0xff]  ;;  %v383_v6 = vpack.c.bf16 %v363_v2, %v363_v2  ;;  %v361_v12 = vld [vmem:[%s990_s7 + $0x50] sm:$0xff]  ;;  %v362_v13 = vld [vmem:[%s990_s7 + $0x58] sm:$0xff]  ;;  %s748_s29 = sshll.u32 %s306_s26, 3  ;;  %s757_s30 = sshll.u32 %s891_s18, 3 }
  0x1a   : > { %v384_v7 = vpack.c.bf16 %v364_v5, %v364_v5  ;;  %v381_v21 = vpack.c.bf16 %v361_v12, %v361_v12  ;;  %v382_v22 = vpack.c.bf16 %v362_v13, %v362_v13  ;;  %v359_v32 = vld [vmem:[%s990_s7 + $0x40] sm:$0xff]  ;;  %v360_v33 = vld [vmem:[%s990_s7 + $0x48] sm:$0xff]  ;;  %v357_v46 = vld [vmem:[%s990_s7 + $0x30] sm:$0xff]  ;;  %s308_s8 = scalar_lea.vmem [#allocation3], %s748_s29  ;;  %s597_s18 = scalar_lea.sflag [#allocation4], %s306_s26 }
  0x1b   : > { %v498_v8 = vunpack.c.l.b16 %v385_v3  ;;  %v499_v9 = vunpack.c.l.b16 %v386_v4  ;;  %v401_v10 = vunpack.c.l.bf16 %v385_v3  ;;  %v402_v11 = vunpack.c.l.bf16 %v386_v4  ;;  %v358_v47 = vld [vmem:[%s990_s7 + $0x38] sm:$0xff]  ;;  %v355_v60 = vld [vmem:[%s990_s7 + $0x20] sm:$0xff]  ;;  %v356_v61 = vld [vmem:[%s990_s7 + $0x28] sm:$0xff]  ;;  %s611_s9 = sshll.u32 %s308_s8, 4  ;;  %s612_s9 = int_to_ptr.vmem [resolvable:$true] %s611_s9 }
  0x1c   : > { %v496_v14 = vunpack.c.l.b16 %v383_v6  ;;  %v399_v15 = vunpack.c.l.bf16 %v383_v6  ;;  %v400_v16 = vunpack.c.l.bf16 %v384_v7  ;;  %v497_v20 = vunpack.c.l.b16 %v384_v7 }
  0x1d   : > { %v507_v17 = vpack.c.b16 %v499_v9, %v498_v8  ;;  %v417_v18 = vsub.f32 %v365_v0, %v401_v10  ;;  %v418_v19 = vsub.f32 %v366_v1, %v402_v11  ;;  %v397_v30 = vunpack.c.l.bf16 %v381_v21  ;;  %v353_v10 = vld [vmem:[%s990_s7 + $0x10] sm:$0xff]  ;;  %v354_v11 = vld [vmem:[%s990_s7 + $0x18] sm:$0xff] }
  0x1e   : > { %v415_v25 = vsub.f32 %v363_v2, %v399_v15  ;;  %v416_v26 = vsub.f32 %v364_v5, %v400_v16  ;;  %v506_v28 = vpack.c.b16 %v497_v20, %v496_v14  ;;  %v398_v31 = vunpack.c.l.bf16 %v382_v22 }
  0x1f   : > { %v530_v23 = vsel %vm427_vm0, %v507_v17, 0  ;;  %v426_v24 = vpack.c.bf16 %v418_v19, %v417_v18  ;;  %v494_v35 = vunpack.c.l.b16 %v381_v21  ;;  %v495_v36 = vunpack.c.l.b16 %v382_v22  ;;  %v568_v21 = vld [vmem:[%s315_s11] sm:$0xff] }
  0x20   : > { %532 = vmatpush.bf16.xpose.msra.mxu1 %v530_v23  ;;  %548 = vmatpush.bf16.xpose.msra.mxu2 %v530_v23  ;;  %v425_v29 = vpack.c.bf16 %v416_v26, %v415_v25  ;;  %v527_v34 = vsel %vm427_vm0, %v506_v28, 0  ;;  %v379_v37 = vpack.c.bf16 %v359_v32, %v359_v32  ;;  %v413_v39 = vsub.f32 %v361_v12, %v397_v30  ;;  %v351_v26 = vld [vmem:[%s990_s7] sm:$0xff] }
  0x21   : > { %v453_v27 = vsel %vm427_vm0, %v426_v24, 0  ;;  %v414_v40 = vsub.f32 %v362_v13, %v398_v31  ;;  %v380_v41 = vpack.c.bf16 %v360_v33, %v360_v33  ;;  %v505_v42 = vpack.c.b16 %v495_v36, %v494_v35 }
  0x22   : > { %455 = vmatpush.bf16.xpose.msra.mxu0 %v453_v27  ;;  %v450_v38 = vsel %vm427_vm0, %v425_v29, 0  ;;  %v395_v44 = vunpack.c.l.bf16 %v379_v37  ;;  %v492_v49 = vunpack.c.l.b16 %v379_v37  ;;  %v377_v51 = vpack.c.bf16 %v357_v46, %v357_v46  ;;  %v352_v27 = vld [vmem:[%s990_s7 + $0x8] sm:$0xff]  ;;  %s609_s7 = scalar_lea.hbm %s1083_s4, %s757_s30 }
  0x23   : > { %v424_v43 = vpack.c.bf16 %v414_v40, %v413_v39  ;;  %v396_v45 = vunpack.c.l.bf16 %v380_v41  ;;  %v524_v48 = vsel %vm427_vm0, %v505_v42, 0  ;;  %v493_v50 = vunpack.c.l.b16 %v380_v41  ;;  %v350_v40 = vld [vmem:[%s331_s14] sm:$0xff]  ;;  %s613_s10 = sshll.u32 %s609_s7, 4  ;;  %s614_s10 = int_to_ptr.hbm [resolvable:$true] %s613_s10 }
  0x24   : > { %v411_v53 = vsub.f32 %v359_v32, %v395_v44  ;;  %v378_v55 = vpack.c.bf16 %v358_v47, %v358_v47  ;;  %v393_v58 = vunpack.c.l.bf16 %v377_v51  ;;  %v490_v63 = vunpack.c.l.b16 %v377_v51  ;;  %s835_s11 = sshra.s32 %s614_s10, 4  ;;  %s836_s11 = int_to_ptr.hbm [resolvable:$true] %s835_s11 }
  0x25   : > { %v447_v52 = vsel %vm427_vm0, %v424_v43, 0  ;;  %v412_v54 = vsub.f32 %v360_v33, %v396_v45  ;;  %v504_v56 = vpack.c.b16 %v493_v50, %v492_v49  ;;  %v375_v1 = vpack.c.bf16 %v355_v60, %v355_v60  ;;  %s837_s12 = scalar_lea.hbm %s836_s11, 8  ;;  %p842_p1 = scmp.lt.s32.totalorder %s836_s11, %s1083_s4 }
  0x26   : > { %v394_v59 = vunpack.c.l.bf16 %v378_v55  ;;  %v491_v0 = vunpack.c.l.b16 %v378_v55  ;;  %v409_v3 = vsub.f32 %v357_v46, %v393_v58  ;;  %v376_v5 = vpack.c.bf16 %v356_v61, %v356_v61  ;;  %v818_v58 = vld [vmem:[%s321_s24] ss:$0 sm:$0xff]  ;;  %p838_p12 = scmp.ne.s32.totalorder %s836_s11, %s837_s12  ;;  %p843_p2 = scmp.lt.s32.totalorder %s841_s21, %s837_s12 }
  0x27   : > { %v423_v57 = vpack.c.bf16 %v412_v54, %v411_v53  ;;  %v521_v62 = vsel %vm427_vm0, %v504_v56, 0  ;;  %v391_v8 = vunpack.c.l.bf16 %v375_v1  ;;  %v488_v13 = vunpack.c.l.b16 %v375_v1 }
  0x28   : > { %533 = vmatpush.bf16.xpose.msra.mxu1 %v527_v34  ;;  %549 = vmatpush.bf16.xpose.msra.mxu2 %v527_v34  ;;  %v410_v4 = vsub.f32 %v358_v47, %v394_v59  ;;  %v503_v6 = vpack.c.b16 %v491_v0, %v490_v63  ;;  %v392_v9 = vunpack.c.l.bf16 %v376_v5  ;;  %v489_v14 = vunpack.c.l.b16 %v376_v5  ;;  %p839_p13 = pnand %p838_p12, %p967_p4  ;;  %p844_p3 = por %p843_p2, %p842_p1 }
  0x29   : > { %v444_v2 = vsel %vm427_vm0, %v423_v57, 0  ;;  %v373_v15 = vpack.c.bf16 %v353_v10, %v353_v10  ;;  %v407_v17 = vsub.f32 %v355_v60, %v391_v8  ;;  %v374_v19 = vpack.c.bf16 %v354_v11, %v354_v11 }
  0x2a   : > { %456 = vmatpush.bf16.xpose.msra.mxu0 %v450_v38  ;;  %v422_v7 = vpack.c.bf16 %v410_v4, %v409_v3  ;;  %v518_v12 = vsel %vm427_vm0, %v503_v6, 0  ;;  %v408_v18 = vsub.f32 %v356_v61, %v392_v9  ;;  %v502_v20 = vpack.c.b16 %v489_v14, %v488_v13  ;;  %p840_p0 = pneg %p839_p13 }
  0x2b   : > { %v389_v22 = vunpack.c.l.bf16 %v373_v15  ;;  %v901_v23 = vmov 0   ;;  %v390_v25 = vunpack.c.l.bf16 %v374_v19  ;;  %v486_v29 = vunpack.c.l.b16 %v373_v15 }
  0x2c   : > { %v441_v16 = vsel %vm427_vm0, %v422_v7, 0  ;;  %817 = vset.pattern.permute.xlu0 %v901_v23  ;;  %v421_v24 = vpack.c.bf16 %v408_v18, %v407_v17  ;;  %v515_v28 = vsel %vm427_vm0, %v502_v20, 0  ;;  %v487_v30 = vunpack.c.l.b16 %v374_v19  ;;  %p845_p5 = pnand %p844_p3, %p840_p0 }
  0x2d   : > { %572 = vperm.xlu0 %817, %v568_v21   ;;  %v405_v31 = vsub.f32 %v353_v10, %v389_v22  ;;  %v406_v33 = vsub.f32 %v354_v11, %v390_v25  ;;  %v371_v34 = vpack.c.bf16 %v351_v26, %v351_v26  ;;  %v372_v35 = vpack.c.bf16 %v352_v27, %v352_v27 }
  0x2e   : > { %v438_v32 = vsel %vm427_vm0, %v421_v24, 0  ;;  %v501_v36 = vpack.c.b16 %v487_v30, %v486_v29  ;;  %v367_v47 = vpack.c.bf16 %v350_v40, %v350_v40 }
  0x2f   : > { %v420_v37 = vpack.c.bf16 %v406_v33, %v405_v31  ;;  %v387_v38 = vunpack.c.l.bf16 %v371_v34  ;;  %v388_v39 = vunpack.c.l.bf16 %v372_v35  ;;  %v484_v42 = vunpack.c.l.b16 %v371_v34 }
  0x30   : > { %534 = vmatpush.bf16.xpose.msra.mxu1 %v524_v48  ;;  %550 = vmatpush.bf16.xpose.msra.mxu2 %v524_v48  ;;  %v512_v41 = vsel %vm427_vm0, %v501_v36, 0  ;;  %v485_v43 = vunpack.c.l.b16 %v372_v35  ;;  %v368_v50 = vunpack.c.l.bf16 %v367_v47 }
  0x31   : > { %v435_v44 = vsel %vm427_vm0, %v420_v37, 0  ;;  %v403_v45 = vsub.f32 %v351_v26, %v387_v38  ;;  %v404_v46 = vsub.f32 %v352_v27, %v388_v39 }
  0x32   : > { %457 = vmatpush.bf16.xpose.msra.mxu0 %v447_v52  ;;  %v500_v48 = vpack.c.b16 %v485_v43, %v484_v42  ;;  %v369_v53 = vsub.f32 %v350_v40, %v368_v50 }
  0x33   : > { %v419_v49 = vpack.c.bf16 %v404_v46, %v403_v45 }
  0x34   : > { %v509_v51 = vsel %vm427_vm0, %v500_v48, 0  ;;  %v370_v54 = vpack.c.bf16 %v369_v53, %v369_v53 }
  0x35   : > { %v432_v52 = vsel %vm427_vm0, %v419_v49, 0 }
  0x38   : > { %535 = vmatpush.bf16.xpose.msra.mxu1 %v521_v62  ;;  %551 = vmatpush.bf16.xpose.msra.mxu2 %v521_v62 }
  0x3a   : > { %458 = vmatpush.bf16.xpose.msra.mxu0 %v444_v2 }
  0x40   : > { %536 = vmatpush.bf16.xpose.msra.mxu1 %v518_v12  ;;  %552 = vmatpush.bf16.xpose.msra.mxu2 %v518_v12 }
  0x42   : > { %459 = vmatpush.bf16.xpose.msra.mxu0 %v441_v16 }
  0x48   : > { %537 = vmatpush.bf16.xpose.msra.mxu1 %v515_v28  ;;  %553 = vmatpush.bf16.xpose.msra.mxu2 %v515_v28 }
  0x4a   : > { %460 = vmatpush.bf16.xpose.msra.mxu0 %v438_v32 }
  0x50   : > { %538 = vmatpush.bf16.xpose.msra.mxu1 %v512_v41  ;;  %554 = vmatpush.bf16.xpose.msra.mxu2 %v512_v41 }
  0x52   : > { %461 = vmatpush.bf16.xpose.msra.mxu0 %v435_v44 }
  0x58   : > { %539 = vmatpush.bf16.xpose.msra.mxu1 %v509_v51  ;;  %555 = vmatpush.bf16.xpose.msra.mxu2 %v509_v51 }
  0x5a   : > { %462 = vmatpush.bf16.xpose.msra.mxu0 %v432_v52 }
  0x5f   : > { %754 = vmatmul.msk.bf16.vlgmr.msra.gmra.mxu1 %vm427_vm0, %v367_v47  ;;  %755 = vmatmul.msk.bf16.vlgmr.msra.gmra.mxu2 %vm427_vm0, %v370_v54 }
  0x61   : > { %753 = vmatmul.msk.bf16.vlgmr.msra.gmra.mxu0 %vm427_vm0, %v367_v47 }
  0x9f   : > { %v573_v59 = vpop.permute.xlu0 %572 }
  0xa0   : > { %v578_v62 = vadd.f32 %v818_v58, %v573_v59 }
  0xdc   : > { %v541_v55 = vpop.f32.mrf.mxu1 }
  0xde   : > { %v464_v56 = vpop.f32.mrf.mxu0 }
  0xdf   : > { %v542_v57 = vadd.f32 %v541_v55, %v464_v56 }
  0xe2   : > { %v557_v60 = vpop.f32.mrf.mxu2 }
  0xe3   : > { %v561_v61 = vadd.f32 %v557_v60, %v542_v57 }
  0xe4   : > { %v543_v63 = vpop.f32.mrf.mxu1 }
  0xe5   : > { %v580_v0 = vmul.f32 2.0, %v561_v61 }
  0xe6   : > { %v466_v1 = vpop.f32.mrf.mxu0 }
  0xe7   : > { %v581_v2 = vsub.f32 %v578_v62, %v580_v0 }
  0xe9   : > { %v582_v3 = vmax.f32 %v581_v2, 0.0 }
  0xea   : > { %v559_v4 = vpop.f32.mrf.mxu2 }
  0xeb   : > { %819 = vrsqrt.f32 %v582_v3  ;;  %vm590_vm1 = vcmp.eq.f32.partialorder %v582_v3, inf  ;;  %v593_v12 = vand.u32 2147483648, %v582_v3  ;;  %vm592_vm2 = vcmp.eq.f32.partialorder %v582_v3, 0.0 }
  0xf1   : > { %v820_v5 = vpop.eup %819 }
  0xf2   : > { %v584_v6 = vmul.f32 %v820_v5, %v582_v3 }
  0xf4   : > { %v585_v7 = vmul.f32 %v820_v5, %v584_v6 }
  0xf6   : > { %v586_v8 = vmul.f32 0.5, %v585_v7 }
  0xf8   : > { %v587_v9 = vsub.f32 1.5, %v586_v8 }
  0xfa   : > { %v588_v10 = vmul.f32 %v820_v5, %v587_v9 }
  0xfc   : > { %v589_v11 = vmul.f32 %v588_v10, %v582_v3 }
  0xfe   : > { %v591_v13 = vsel %vm590_vm1, %v582_v3, %v589_v11 }
  0xff   : > { %v594_v14 = vsel %vm592_vm2, %v593_v12, %v591_v13 }
 0x100   : > { %595 = vst [vmem:[%s308_s8] sm:$0xff] %v594_v14 }
 0x101   : > { %848 = shalt.err (!%p845_p5)
}
 0x102   : > { %761 = dma.vmem_to_hbm [thread:$0]  (%p967_p4), %s612_s9, 128, %s614_s10, %s597_s18  }
 0x103 PF: > { %p767_p6 = scmp.ge.s32.totalorder %s899_s20, 2  ;;  %s625_s26 = sand.u32 1, %s879_s15  }
 0x104   : > { %s626_s29 = scalar_lea.sflag [#allocation4], %s625_s26 }
 0x105   : > { %p764_p7 = pnand %p767_p6, %p974_p8 }
 0x107   : > { %p765_p9 = pneg %p764_p7 }
 0x109   : > { %874 = dma.done.wait (%p765_p9), %s626_s29, 128  }
 0x10a   : > { %876 = vsyncadd (%p765_p9), %s626_s29, 4294967168  ;;  %s17_s20 = sadd.s32 1, %s899_s20   ;;  %s1086_s15 = smov %s883_s16 }
 0x10b   : > { %p14_p10 = scmp.ge.s32.totalorder %s17_s20, 4   ;;  %s1087_s16 = smov %s887_s17 }
 0x10c   : > { %s1088_s17 = smov %s980_s28  ;;  %s1089_s18 = smov %s895_s19 }
 0x10d   : > { %s1090_s19 = smov %s1092_s23  ;;  %16 = sbr.rel (!%p14_p10) target bundleno = 4 (0x4), region = 88 }
 0x112   :  { %632 = vsyncpa [#allocation4], 1 }
 0x113   :  { %634 = vsyncpa [#allocation4 + $0x1], 1 }

</bundles_post_ra>
